<compile_context>
chip_gen: v7x
topology: tpu7x:2x2x1
jax: 0.10.0
libtpu: 0.0.40
codegen_flags: <defaults>
</compile_context>

<pallas_src>
import functools

import jax
import jax.numpy as jnp
from jax import lax
from jax.experimental import pallas as pl
from jax.experimental.pallas import tpu as pltpu

_LANES = 128          # per-gate column block width (TPU lane width)
_SUBLANES_BF16 = 16   # bf16 sublane tile -> pad the (T, Hp) x-block rows to this


def _round_up(x, m):
    return (x + m - 1) // m * m


def _sigmoid(x):
    # exp -> EUP slot; approximate reciprocal -> EUP slot (off the VPU chain).
    return pl.reciprocal(1.0 + jnp.exp(-x), approx=True)


# ---------------------------------------------------------------------------
# Kernel: whole sequence in one invocation
# ---------------------------------------------------------------------------
def _gru_seq_kernel(x_ref,    # VMEM (Tp, Hp)   bf16 pre-gathered embedding rows
                    wx_ref,   # VMEM (Hp, 3Hp)  bf16 input->gate weights  [r|z|n]
                    wh_ref,   # VMEM (Hp, 3Hp)  bf16 hidden->gate weights [r|z|n]
                    bx_ref,   # VMEM (1, 3Hp)   f32  input bias  [b_ir|b_iz|b_in]
                    bh_ref,   # VMEM (1, 3Hp)   f32  hidden bias [b_hr|b_hz|b_hn]
                    h0_ref,   # VMEM (1, Hp)    f32  initial hidden state
                    out_ref,  # VMEM (Tp, Hp)   f32  per-step hidden states
                    gx_scr,   # VMEM (Tp, 3Hp)  f32  hoisted x-projection
                    h_scr,    # VMEM (1, Hp)    f32  carried hidden state
                    *, seq_len):
    Hp = h0_ref.shape[-1]

    # Prologue: one batched MXU pass (M = Tp) computes x_t @ W_i + b_i for
    # every time step, removing half of the matmul work (and the concat) from
    # the serial recurrence.
    gx_scr[...] = (
        jnp.dot(x_ref[...], wx_ref[...], preferred_element_type=jnp.float32)
        + bx_ref[...])

    out_ref[...] = jnp.zeros_like(out_ref)   # deterministic padded rows
    h_scr[...] = h0_ref[...]

    def step(t, carry):
        h = h_scr[...]                                            # (1, Hp) f32
        # Recurrent projection: the only per-step MXU work (K=Hp, N=3Hp).
        gh = (jnp.dot(h.astype(wh_ref.dtype), wh_ref[...],
                      preferred_element_type=jnp.float32)
              + bh_ref[...])                                      # (1, 3Hp) f32
        gx = gx_scr[pl.ds(t, 1), :]                               # (1, 3Hp) f32

        # PyTorch GRU equations, gate order [r, z, n]; lane-aligned slices.
        r = _sigmoid(gx[:, 0:Hp] + gh[:, 0:Hp])
        z = _sigmoid(gx[:, Hp:2 * Hp] + gh[:, Hp:2 * Hp])
        n = jnp.tanh(gx[:, 2 * Hp:3 * Hp] + r * gh[:, 2 * Hp:3 * Hp])
        h_new = (1.0 - z) * n + z * h                             # (1, Hp) f32

        h_scr[...] = h_new
        out_ref[pl.ds(t, 1), :] = h_new
        return carry

    lax.fori_loop(0, seq_len, step, 0, unroll=(seq_len <= 16))


# ---------------------------------------------------------------------------
# Parameter packing (done once, outside the kernel)
# ---------------------------------------------------------------------------
def pack_params(params, hidden_size, weight_dtype=jnp.bfloat16):
    """Repack PyTorch-layout Embedding/GRU params into the lane-padded layout.

    params: embedding (V, H); w_ih / w_hh (3H, H) gate order [r|z|n]; b_ih/b_hh (3H,).
    Produces (Hp = H rounded up to 128):
      emb : (V, Hp)     bf16
      w_x : (Hp, 3Hp)   bf16, column blocks [W_ir^T | W_iz^T | W_in^T]
      w_h : (Hp, 3Hp)   bf16, column blocks [W_hr^T | W_hz^T | W_hn^T]
      b_x : (1, 3Hp)    f32,  [b_ir | b_iz | b_in]
      b_h : (1, 3Hp)    f32,  [b_hr | b_hz | b_hn]
    """
    H = hidden_size
    Hp = _round_up(H, _LANES)
    emb = params["embedding"]
    V = emb.shape[0]

    emb_pad = jnp.zeros((V, Hp), jnp.float32).at[:, :H].set(emb)

    w_ih, w_hh = params["w_ih"], params["w_hh"]        # (3H, H), PyTorch layout
    b_ih, b_hh = params["b_ih"], params["b_hh"]        # (3H,)

    def pad_w(w):      # (3H, H) -> (Hp, 3Hp), rows = input lanes, cols = gate blocks
        out = jnp.zeros((Hp, 3 * Hp), jnp.float32)
        for g in range(3):
            out = out.at[:H, g * Hp:g * Hp + H].set(w[g * H:(g + 1) * H, :].T)
        return out

    def pad_b(b):      # (3H,) -> (1, 3Hp)
        out = jnp.zeros((1, 3 * Hp), jnp.float32)
        for g in range(3):
            out = out.at[0, g * Hp:g * Hp + H].set(b[g * H:(g + 1) * H])
        return out

    return {
        "emb": emb_pad.astype(weight_dtype),
        "w_x": pad_w(w_ih).astype(weight_dtype),
        "w_h": pad_w(w_hh).astype(weight_dtype),
        "b_x": pad_b(b_ih).astype(jnp.float32),
        "b_h": pad_b(b_hh).astype(jnp.float32),
        "H": H, "Hp": Hp, "V": V,
    }


# ---------------------------------------------------------------------------
# Wrappers
# ---------------------------------------------------------------------------
def encoder_rnn_sequence(tokens, hidden, packed):
    """Run all T GRU steps of the encoder inside ONE pallas_call (no grid).

    tokens: (T,) int32; hidden: (1, 1, H) f32 initial state.
    Returns (outputs (T, 1, H), hidden (1, 1, H)) — equivalent to calling the
    PyTorch EncoderRNN.forward once per token while threading the hidden state.
    """
    H, Hp, V = packed["H"], packed["Hp"], packed["V"]
    emb, w_x, w_h = packed["emb"], packed["w_x"], packed["w_h"]
    b_x, b_h = packed["b_x"], packed["b_h"]

    # Clamp token ids (semantic divergence from PyTorch: OOB tokens do not fail).
    tokens = jnp.clip(jnp.asarray(tokens, jnp.int32).reshape(-1), 0, V - 1)
    T = int(tokens.shape[0])
    Tp = _round_up(max(T, 1), _SUBLANES_BF16)

    # Pre-gather the T embedding rows in the wrapper: removes every per-step
    # embedding DMA from the serial path and enables the batched x-projection.
    x_rows = jnp.take(emb, tokens, axis=0)                           # (T, Hp) bf16
    x_emb = jnp.zeros((Tp, Hp), emb.dtype).at[:T, :].set(x_rows)

    h0 = jnp.zeros((1, Hp), jnp.float32).at[:, :H].set(
        hidden.reshape(1, H).astype(jnp.float32))

    # Everything is single-buffered (no grid), so VMEM footprint is just the sum.
    vmem_needed = (
        x_emb.size * x_emb.dtype.itemsize
        + w_x.size * w_x.dtype.itemsize + w_h.size * w_h.dtype.itemsize
        + b_x.size * 4 + b_h.size * 4 + h0.size * 4
        + Tp * Hp * 4            # output buffer
        + Tp * 3 * Hp * 4        # hoisted x-projection scratch
        + Hp * 4)                # hidden-state scratch
    vmem_limit = int(min(max(4 * vmem_needed, 16 << 20), 64 << 20))

    hs = pl.pallas_call(
        functools.partial(_gru_seq_kernel, seq_len=T),
        out_shape=jax.ShapeDtypeStruct((Tp, Hp), jnp.float32),
        in_specs=[pl.BlockSpec(memory_space=pltpu.MemorySpace.VMEM)] * 6,
        out_specs=pl.BlockSpec(memory_space=pltpu.MemorySpace.VMEM),
        scratch_shapes=[pltpu.VMEM((Tp, 3 * Hp), jnp.float32),
                        pltpu.VMEM((1, Hp), jnp.float32)],
        compiler_params=pltpu.CompilerParams(vmem_limit_bytes=vmem_limit),
    )(x_emb, w_x, w_h, b_x, b_h, h0)

    outputs = hs[:T, :H].reshape(T, 1, H)
    hidden_out = hs[T - 1, :H].reshape(1, 1, H)
    return outputs, hidden_out


def encoder_rnn_forward(token_id, hidden, packed):
    """Single step — exactly the PyTorch EncoderRNN.forward(input, hidden)."""
    # TODO(synk): the module's host-side print(input.size()) debug calls are omitted.
    tokens = jnp.asarray(token_id, jnp.int32).reshape(-1)[:1]
    outputs, hidden_out = encoder_rnn_sequence(tokens, hidden, packed)
    return outputs.reshape(1, 1, packed["H"]), hidden_out


# ---------------------------------------------------------------------------
# Parameter init + references
# ---------------------------------------------------------------------------
def init_params(key, input_size, hidden_size):
    """Deterministic synthetic parameters in PyTorch layout (Embedding + GRU)."""
    H = hidden_size
    k_emb, k_wih, k_whh, k_bih, k_bhh = jax.random.split(key, 5)
    scale = 1.0 / float(jnp.sqrt(H))
    u = lambda k, shape: jax.random.uniform(k, shape, jnp.float32, -1.0, 1.0) * scale
    return {
        "embedding": jax.random.normal(k_emb, (input_size, H), jnp.float32),
        "w_ih": u(k_wih, (3 * H, H)),     # weight_ih_l0, gates [r|z|n]
        "w_hh": u(k_whh, (3 * H, H)),     # weight_hh_l0
        "b_ih": u(k_bih, (3 * H,)),
        "b_hh": u(k_bhh, (3 * H,)),
    }


def _reference_packed(tokens, hidden, packed):
    """Pure-JAX reference using the SAME packed (bf16) params and layout."""
    H, Hp, V = packed["H"], packed["Hp"], packed["V"]
    tokens = jnp.clip(jnp.asarray(tokens, jnp.int32).reshape(-1), 0, V - 1)
    T = int(tokens.shape[0])
    h = jnp.zeros((1, Hp), jnp.float32).at[:, :H].set(
        hidden.reshape(1, H).astype(jnp.float32))
    w_x, w_h = packed["w_x"], packed["w_h"]
    b_x, b_h = packed["b_x"], packed["b_h"]
    outs = []
    for i in range(T):
        x = packed["emb"][tokens[i]][None, :]
        gx = jnp.dot(x, w_x, preferred_element_type=jnp.float32) + b_x
        gh = jnp.dot(h.astype(w_h.dtype), w_h,
                     preferred_element_type=jnp.float32) + b_h
        r = 1.0 / (1.0 + jnp.exp(-(gx[:, 0:Hp] + gh[:, 0:Hp])))
        z = 1.0 / (1.0 + jnp.exp(-(gx[:, Hp:2 * Hp] + gh[:, Hp:2 * Hp])))
        n = jnp.tanh(gx[:, 2 * Hp:3 * Hp] + r * gh[:, 2 * Hp:3 * Hp])
        h = (1.0 - z) * n + z * h
        outs.append(h[:, :H])
    return jnp.stack(outs, axis=0), h[:, :H].reshape(1, 1, H)


def _reference_f32(tokens, hidden, params):
    """Full-precision PyTorch-equation reference with the original (unpacked) params."""
    emb = params["embedding"]
    H = emb.shape[1]
    w_ih_t, w_hh_t = params["w_ih"].T, params["w_hh"].T
    b_ih, b_hh = params["b_ih"][None, :], params["b_hh"][None, :]
    tokens = jnp.asarray(tokens, jnp.int32).reshape(-1)
    h = hidden.reshape(1, H).astype(jnp.float32)
    outs = []
    for i in range(int(tokens.shape[0])):
        x = emb[tokens[i]][None, :]
        gi = x @ w_ih_t + b_ih
        gh = h @ w_hh_t + b_hh
        r = 1.0 / (1.0 + jnp.exp(-(gi[:, :H] + gh[:, :H])))
        z = 1.0 / (1.0 + jnp.exp(-(gi[:, H:2 * H] + gh[:, H:2 * H])))
        n = jnp.tanh(gi[:, 2 * H:] + r * gh[:, 2 * H:])
        h = (1.0 - z) * n + z * h
        outs.append(h)
    return jnp.stack(outs, axis=0), h.reshape(1, 1, H)


# ---------------------------------------------------------------------------
if __name__ == "__main__":
    input_size = 20      # vocabulary size V
    hidden_size = 32     # H

    key = jax.random.PRNGKey(0)
    params = init_params(key, input_size, hidden_size)
    packed = pack_params(params, hidden_size)

    # ---- single-step call: exactly the PyTorch module forward ----
    token_id = jnp.array([7], dtype=jnp.int32)
    hidden0 = jnp.zeros((1, 1, hidden_size), jnp.float32)   # initHidden()

    output, hidden = encoder_rnn_forward(token_id, hidden0, packed)
    jax.block_until_ready((output, hidden))

    assert output.shape == (1, 1, hidden_size)
    assert hidden.shape == (1, 1, hidden_size)

    ref_out, ref_hid = _reference_packed(token_id, hidden0, packed)
    # Tolerance absorbs the approx-reciprocal sigmoid (EUP) vs exact divide.
    assert jnp.allclose(output, ref_out.reshape(1, 1, hidden_size),
                        atol=1e-2, rtol=2e-2)
    assert jnp.allclose(hidden, ref_hid, atol=1e-2, rtol=2e-2)

    f32_out, _ = _reference_f32(token_id, hidden0, params)
    assert jnp.allclose(output, f32_out.reshape(1, 1, hidden_size), atol=8e-2)

    # ---- multi-step: whole token sequence in one pallas_call (recurrence in-kernel) ----
    tokens = jnp.array([3, 7, 1, 0, 12, 19, 5, 11], dtype=jnp.int32)   # T = 8
    outs, hid_T = encoder_rnn_sequence(tokens, hidden0, packed)
    jax.block_until_ready((outs, hid_T))

    ref_outs, ref_hid_T = _reference_packed(tokens, hidden0, packed)
    assert outs.shape == (int(tokens.shape[0]), 1, hidden_size)
    assert jnp.allclose(outs, ref_outs, atol=1e-2, rtol=2e-2)
    assert jnp.allclose(hid_T, ref_hid_T, atol=1e-2, rtol=2e-2)

    f32_outs, _ = _reference_f32(tokens, hidden0, params)
    assert jnp.allclose(outs, f32_outs, atol=8e-2)

    print("KERNEL_OK")
</pallas_src>

<mosaic_0001>
module attributes {stable_mosaic.version = 11 : i64} {
  func.func @_gru_seq_kernel(%arg0: memref<16x128xbf16, #tpu.memory_space<vmem>>, %arg1: memref<128x384xbf16, #tpu.memory_space<vmem>>, %arg2: memref<128x384xbf16, #tpu.memory_space<vmem>>, %arg3: memref<1x384xf32, #tpu.memory_space<vmem>>, %arg4: memref<1x384xf32, #tpu.memory_space<vmem>>, %arg5: memref<1x128xf32, #tpu.memory_space<vmem>>, %arg6: memref<16x128xf32, #tpu.memory_space<vmem>>, %arg7: memref<16x384xf32, #tpu.memory_space<vmem>>, %arg8: memref<1x128xf32, #tpu.memory_space<vmem>>) attributes {dimension_semantics = [], scalar_prefetch = 0 : i64, scratch_operands = 2 : i64, tpu.core_type = #tpu.core_type<tc>} {
    %c0 = arith.constant 0 : index
    %c0_0 = arith.constant 0 : index
    %0 = vector.load %arg0[%c0, %c0_0] : memref<16x128xbf16, #tpu.memory_space<vmem>>, vector<16x128xbf16>
    %c0_1 = arith.constant 0 : index
    %c0_2 = arith.constant 0 : index
    %1 = vector.load %arg1[%c0_1, %c0_2] : memref<128x384xbf16, #tpu.memory_space<vmem>>, vector<128x384xbf16>
    %cst = arith.constant dense<0.000000e+00> : vector<16x384xf32>
    %2 = tpu.matmul %0, %1, %cst {dimension_numbers = #tpu.dot_dimension_numbers<[1], [0], [0], [1], [0, 0, 1, 1], [], []>} : vector<16x128xbf16>, vector<128x384xbf16>, vector<16x384xf32> -> vector<16x384xf32>
    %c0_3 = arith.constant 0 : index
    %c0_4 = arith.constant 0 : index
    %3 = vector.load %arg3[%c0_3, %c0_4] : memref<1x384xf32, #tpu.memory_space<vmem>>, vector<1x384xf32>
    %4 = vector.broadcast %3 : vector<1x384xf32> to vector<16x384xf32>
    %5 = arith.addf %2, %4 : vector<16x384xf32>
    %c0_5 = arith.constant 0 : index
    %c0_6 = arith.constant 0 : index
    %6 = vector.load %arg7[%c0_5, %c0_6] : memref<16x384xf32, #tpu.memory_space<vmem>>, vector<16x384xf32>
    tpu.vector_store %arg7[%c0_5, %c0_6], %5 {strides = array<i32>} : memref<16x384xf32, #tpu.memory_space<vmem>>, vector<16x384xf32>,
    %cst_7 = arith.constant 0.000000e+00 : f32
    %7 = vector.broadcast %cst_7 : f32 to vector<16x128xf32>
    %c0_8 = arith.constant 0 : index
    %c0_9 = arith.constant 0 : index
    %8 = vector.load %arg6[%c0_8, %c0_9] : memref<16x128xf32, #tpu.memory_space<vmem>>, vector<16x128xf32>
    tpu.vector_store %arg6[%c0_8, %c0_9], %7 {strides = array<i32>} : memref<16x128xf32, #tpu.memory_space<vmem>>, vector<16x128xf32>,
    %c0_10 = arith.constant 0 : index
    %c0_11 = arith.constant 0 : index
    %9 = vector.load %arg5[%c0_10, %c0_11] : memref<1x128xf32, #tpu.memory_space<vmem>>, vector<1x128xf32>
    %c0_12 = arith.constant 0 : index
    %c0_13 = arith.constant 0 : index
    %10 = vector.load %arg8[%c0_12, %c0_13] : memref<1x128xf32, #tpu.memory_space<vmem>>, vector<1x128xf32>
    tpu.vector_store %arg8[%c0_12, %c0_13], %9 {strides = array<i32>} : memref<1x128xf32, #tpu.memory_space<vmem>>, vector<1x128xf32>,
    %c0_i32 = arith.constant 0 : i32
    %c0_14 = arith.constant 0 : index
    %c0_15 = arith.constant 0 : index
    %11 = vector.load %arg8[%c0_14, %c0_15] : memref<1x128xf32, #tpu.memory_space<vmem>>, vector<1x128xf32>
    %12 = arith.truncf %11 : vector<1x128xf32> to vector<1x128xbf16>
    %c0_16 = arith.constant 0 : index
    %c0_17 = arith.constant 0 : index
    %13 = vector.load %arg2[%c0_16, %c0_17] : memref<128x384xbf16, #tpu.memory_space<vmem>>, vector<128x384xbf16>
    %cst_18 = arith.constant dense<0.000000e+00> : vector<1x384xf32>
    %14 = tpu.matmul %12, %13, %cst_18 {dimension_numbers = #tpu.dot_dimension_numbers<[1], [0], [0], [1], [0, 0, 1, 1], [], []>} : vector<1x128xbf16>, vector<128x384xbf16>, vector<1x384xf32> -> vector<1x384xf32>
    %c0_19 = arith.constant 0 : index
    %c0_20 = arith.constant 0 : index
    %15 = vector.load %arg4[%c0_19, %c0_20] : memref<1x384xf32, #tpu.memory_space<vmem>>, vector<1x384xf32>
    %16 = arith.addf %14, %15 : vector<1x384xf32>
    %17 = arith.index_cast %c0_i32 : i32 to index
    %c0_21 = arith.constant 0 : index
    %18 = vector.load %arg7[%17, %c0_21] : memref<16x384xf32, #tpu.memory_space<vmem>>, vector<1x384xf32>
    %19 = vector.extract_strided_slice %18 {offsets = [0, 0], sizes = [1, 128], strides = [1, 1]} : vector<1x384xf32> to vector<1x128xf32>
    %20 = vector.extract_strided_slice %16 {offsets = [0, 0], sizes = [1, 128], strides = [1, 1]} : vector<1x384xf32> to vector<1x128xf32>
    %21 = arith.addf %19, %20 : vector<1x128xf32>
    %cst_22 = arith.constant 0.000000e+00 : f32
    %22 = vector.broadcast %cst_22 : f32 to vector<1x128xf32>
    %23 = arith.subf %22, %21 : vector<1x128xf32>
    %24 = math.exp %23 : vector<1x128xf32>
    %cst_23 = arith.constant 1.000000e+00 : f32
    %25 = vector.broadcast %cst_23 : f32 to vector<1x128xf32>
    %26 = arith.addf %25, %24 : vector<1x128xf32>
    %27 = tpu.reciprocal %26 {approx = true} : vector<1x128xf32> -> vector<1x128xf32>
    %28 = vector.extract_strided_slice %18 {offsets = [0, 128], sizes = [1, 128], strides = [1, 1]} : vector<1x384xf32> to vector<1x128xf32>
    %29 = vector.extract_strided_slice %16 {offsets = [0, 128], sizes = [1, 128], strides = [1, 1]} : vector<1x384xf32> to vector<1x128xf32>
    %30 = arith.addf %28, %29 : vector<1x128xf32>
    %cst_24 = arith.constant 0.000000e+00 : f32
    %31 = vector.broadcast %cst_24 : f32 to vector<1x128xf32>
    %32 = arith.subf %31, %30 : vector<1x128xf32>
    %33 = math.exp %32 : vector<1x128xf32>
    %cst_25 = arith.constant 1.000000e+00 : f32
    %34 = vector.broadcast %cst_25 : f32 to vector<1x128xf32>
    %35 = arith.addf %34, %33 : vector<1x128xf32>
    %36 = tpu.reciprocal %35 {approx = true} : vector<1x128xf32> -> vector<1x128xf32>
    %37 = vector.extract_strided_slice %18 {offsets = [0, 256], sizes = [1, 128], strides = [1, 1]} : vector<1x384xf32> to vector<1x128xf32>
    %38 = vector.extract_strided_slice %16 {offsets = [0, 256], sizes = [1, 128], strides = [1, 1]} : vector<1x384xf32> to vector<1x128xf32>
    %39 = arith.mulf %27, %38 : vector<1x128xf32>
    %40 = arith.addf %37, %39 : vector<1x128xf32>
    %41 = math.tanh %40 : vector<1x128xf32>
    %cst_26 = arith.constant 1.000000e+00 : f32
    %42 = vector.broadcast %cst_26 : f32 to vector<1x128xf32>
    %43 = arith.subf %42, %36 : vector<1x128xf32>
    %44 = arith.mulf %43, %41 : vector<1x128xf32>
    %45 = arith.mulf %36, %11 : vector<1x128xf32>
    %46 = arith.addf %44, %45 : vector<1x128xf32>
    %c0_27 = arith.constant 0 : index
    %c0_28 = arith.constant 0 : index
    %47 = vector.load %arg8[%c0_27, %c0_28] : memref<1x128xf32, #tpu.memory_space<vmem>>, vector<1x128xf32>
    tpu.vector_store %arg8[%c0_27, %c0_28], %46 {strides = array<i32>} : memref<1x128xf32, #tpu.memory_space<vmem>>, vector<1x128xf32>,
    %48 = arith.index_cast %c0_i32 : i32 to index
    %c0_29 = arith.constant 0 : index
    %49 = vector.load %arg6[%48, %c0_29] : memref<16x128xf32, #tpu.memory_space<vmem>>, vector<1x128xf32>
    tpu.vector_store %arg6[%48, %c0_29], %46 {strides = array<i32>} : memref<16x128xf32, #tpu.memory_space<vmem>>, vector<1x128xf32>,
    %c1_i32 = arith.constant 1 : i32
    return
  }
}

</mosaic_0001>

<bundles_post_ra>
// kernel: tpu_custom_call.1
= control target key start
LH: loop header
LB: loop body
LE: loop exit
PB: predicated region body
PF: predicated region fallthrough
CT: control target
= control target key end

     0   :  { %11 = vsyncpa [#allocation5], 0  ;;  %s1079_s0 = inlined_call_operand.hbm [shape: bf16[16,128], index: 0, kind: input, shape index: {}]   ;;  %s1080_s1 = inlined_call_operand.hbm [shape: bf16[128,384], index: 1, kind: input, shape index: {}]   ;;  %s1081_s2 = inlined_call_operand.hbm [shape: bf16[128,384], index: 2, kind: input, shape index: {}]   ;;  %s1082_s3 = inlined_call_operand.vmem [shape: f32[1,384], index: 3, kind: input, shape index: {}]   ;;  %s1083_s4 = inlined_call_operand.vmem [shape: f32[1,384], index: 4, kind: input, shape index: {}]   ;;  %s1084_s5 = inlined_call_operand.vmem [shape: f32[1,128], index: 5, kind: input, shape index: {}]   ;;  %s1085_s6 = inlined_call_operand.hbm [shape: f32[16,128], index: 6, kind: output, shape index: {}]  }
   0x1   :  { %12 = vsyncpa [#allocation8], 0 }
   0x2   :  { %13 = vsyncpa [#allocation6], 0  ;;  %s939_s21 = smov [#allocation7]   ;;  %s845_s25 = scalar_lea.hbm %s1080_s1, 3072 }
   0x3   :  { %s31_s22 = sshll.u32 %s939_s21, 4  ;;  %p846_p0 = scmp.ne.s32.totalorder %s1080_s1, %s845_s25  ;;  %s32_s22 = int_to_ptr.vmem [resolvable:$true] %s31_s22 }
   0x4   :  { %p849_p1 = scmp.lt.u32.totalorder %s845_s25, %s1080_s1 }
   0x6   :  { %p851_p2 = pnand %p849_p1, %p846_p0 }
   0x8   :  { %854 = shalt.err (!%p851_p2)
}
   0x9   :  { %s855_s30 = scalar_lea.vmem %s32_s22, 3072  ;;  %p860_p4 = scmp.lt.s32.totalorder %s32_s22, %s32_s22 }
   0xa   :  { %p856_p3 = scmp.ne.s32.totalorder %s32_s22, %s855_s30  ;;  %p861_p5 = scmp.lt.s32.totalorder %s855_s30, %s855_s30 }
   0xc   :  { %p862_p6 = por %p861_p5, %p860_p4 }
   0xe   :  { %p863_p7 = pnand %p862_p6, %p856_p3 }
  0x10   :  { %866 = shalt.err (!%p863_p7)
}
  0x11   :  { %s940_s7 = smov 192   ;;  %s941_s8 = smov 12  }
  0x12   :  { %37 = dma.hbm_to_vmem [thread:$0]  %s1080_s1, 3072, %s32_s22, [#allocation8], %s940_s7, %s940_s7, %s941_s8  }
  0x13   :  { %s942_s11 = smov [#allocation4]   ;;  %s867_s15 = scalar_lea.hbm %s1079_s0, 128 }
  0x14   :  { %s19_s12 = sshll.u32 %s942_s11, 4  ;;  %p868_p8 = scmp.ne.s32.totalorder %s1079_s0, %s867_s15  ;;  %s20_s12 = int_to_ptr.vmem [resolvable:$true] %s19_s12 }
  0x15   :  { %p871_p9 = scmp.lt.u32.totalorder %s867_s15, %s1079_s0 }
  0x17   :  { %p873_p10 = pnand %p871_p9, %p868_p8 }
  0x19   :  { %876 = shalt.err (!%p873_p10)
}
  0x1a   :  { %s877_s20 = scalar_lea.vmem %s20_s12, 128  ;;  %p882_p12 = scmp.lt.s32.totalorder %s20_s12, %s20_s12 }
  0x1b   :  { %p878_p11 = scmp.ne.s32.totalorder %s20_s12, %s877_s20  ;;  %p883_p13 = scmp.lt.s32.totalorder %s877_s20, %s877_s20 }
  0x1d   :  { %p884_p0 = por %p883_p13, %p882_p12 }
  0x1f   :  { %p885_p1 = pnand %p884_p0, %p878_p11 }
  0x21   :  { %888 = shalt.err (!%p885_p1)
}
  0x22   :  { %s943_s1 = smov 64   ;;  %s944_s21 = smov 4  }
  0x23   :  { %25 = dma.hbm_to_vmem [thread:$0]  %s1079_s0, 128, %s20_s12, [#allocation5], %s943_s1, %s943_s1, %s944_s21  }
  0x24   :  { %s945_s24 = smov [#allocation9]   ;;  %s889_s28 = scalar_lea.hbm %s1081_s2, 3072 }
  0x25   :  { %s43_s25 = sshll.u32 %s945_s24, 4  ;;  %p890_p2 = scmp.ne.s32.totalorder %s1081_s2, %s889_s28  ;;  %s44_s25 = int_to_ptr.vmem [resolvable:$true] %s43_s25 }
  0x26   :  { %p893_p3 = scmp.lt.u32.totalorder %s889_s28, %s1081_s2 }
  0x28   :  { %p895_p4 = pnand %p893_p3, %p890_p2 }
  0x2a   :  { %898 = shalt.err (!%p895_p4)
}
  0x2b   :  { %s899_s11 = scalar_lea.vmem %s44_s25, 3072  ;;  %p904_p6 = scmp.lt.s32.totalorder %s44_s25, %s44_s25 }
  0x2c   :  { %p900_p5 = scmp.ne.s32.totalorder %s44_s25, %s899_s11  ;;  %p905_p7 = scmp.lt.s32.totalorder %s899_s11, %s899_s11 }
  0x2e   :  { %p906_p8 = por %p905_p7, %p904_p6 }
  0x30   :  { %p907_p9 = pnand %p906_p8, %p900_p5 }
  0x32   :  { %910 = shalt.err (!%p907_p9)
}
  0x33   :  { %49 = dma.hbm_to_vmem [thread:$0]  %s1081_s2, 3072, %s44_s25, [#allocation8], %s940_s7, %s940_s7, %s941_s8  }
  0x34   :  { %933 = dma.done.wait [#allocation5], 128  }
  0x35   :  { %934 = vsyncadd [#allocation5], 4294967168 }
  0x36   :  { %935 = dma.done.wait [#allocation8], 6144  }
  0x37   :  { %936 = vsyncadd [#allocation8], 4294961152  ;;  %v946_v0 = vmov 0.0   ;;  %v947_v1 = vmov 0   ;;  %vm948_vm0 = vmmov 0   ;;  %v802_v27 = vld [vmem:[#allocation4] sm:$0xff]   ;;  %v102_v54 = vlaneseq }
  0x38   :  { %717 = vmatprep.subr.bf16.mxu1 %v946_v0  ;;  %341 = vst [vmem:[#allocation10] sm:$0xff] %v946_v0  ;;  %342 = vst [vmem:[#allocation10 + $0x8] sm:$0xff] %v946_v0  ;;  %283 = vmatprep.mubr.bf16.mxu0 %v947_v1  ;;  %v770_v2 = vld [vmem:[#allocation7 + $0x4] ss:$12 sps:$4 sm:$0xff]   ;;  %v772_v3 = vld [vmem:[#allocation7] ss:$12 sps:$4 sm:$0xff]  }
  0x39   :  { %733 = vmatprep.mubr.msk.bf16.mxu1 %vm948_vm0, %v946_v0  ;;  %251 = vmatprep.subr.bf16.mxu0 %v770_v2  ;;  %v773_v4 = vld [vmem:[#allocation7 + $0x8] ss:$12 sps:$4 sm:$0xff]   ;;  %v776_v6 = vld [vmem:[#allocation7 + $0x18] ss:$12 sps:$4 sm:$0xff]   ;;  %v777_v7 = vld [vmem:[#allocation7 + $0x20] ss:$12 sps:$4 sm:$0xff]  }
  0x3a   :  { %252 = vmatpush1.bf16.msra.mxu0 %v772_v3  ;;  %v774_v5 = vld [vmem:[#allocation7 + $0x1c] ss:$12 sps:$4 sm:$0xff]   ;;  %718 = vmatpush3.bf16.msra.mxu1 %v773_v4  ;;  %v778_v8 = vld [vmem:[#allocation7 + $0x34] ss:$12 sps:$4 sm:$0xff]   ;;  %v781_v10 = vld [vmem:[#allocation7 + $0x38] ss:$12 sps:$4 sm:$0xff]  }
  0x3b   :  { %253 = vmatprep.subr.bf16.mxu0 %v774_v5  ;;  %719 = vmatprep.subr.bf16.mxu1 %v946_v0  ;;  %v780_v9 = vld [vmem:[#allocation7 + $0x30] ss:$12 sps:$4 sm:$0xff]   ;;  %v782_v11 = vld [vmem:[#allocation7 + $0x4c] ss:$12 sps:$4 sm:$0xff]   ;;  %v784_v12 = vld [vmem:[#allocation7 + $0x48] ss:$12 sps:$4 sm:$0xff]  }
  0x3c   :  { %v785_v13 = vld [vmem:[#allocation7 + $0x50] ss:$12 sps:$4 sm:$0xff]   ;;  %v788_v15 = vld [vmem:[#allocation7 + $0x60] ss:$12 sps:$4 sm:$0xff]   ;;  %v789_v16 = vld [vmem:[#allocation7 + $0x68] ss:$12 sps:$4 sm:$0xff]  }
  0x3d   :  { %v786_v14 = vld [vmem:[#allocation7 + $0x64] ss:$12 sps:$4 sm:$0xff]   ;;  %v790_v17 = vld [vmem:[#allocation7 + $0x7c] ss:$12 sps:$4 sm:$0xff]   ;;  %v793_v19 = vld [vmem:[#allocation7 + $0x80] ss:$12 sps:$4 sm:$0xff]  }
  0x3e   :  { %254 = vmatpush1.bf16.msra.mxu0 %v776_v6  ;;  %720 = vmatpush3.bf16.msra.mxu1 %v777_v7  ;;  %v792_v18 = vld [vmem:[#allocation7 + $0x78] ss:$12 sps:$4 sm:$0xff]   ;;  %v794_v20 = vld [vmem:[#allocation7 + $0x94] ss:$12 sps:$4 sm:$0xff]   ;;  %v796_v21 = vld [vmem:[#allocation7 + $0x90] ss:$12 sps:$4 sm:$0xff]  }
  0x3f   :  { %255 = vmatprep.subr.bf16.mxu0 %v778_v8  ;;  %721 = vmatprep.subr.bf16.mxu1 %v946_v0  ;;  %v797_v22 = vld [vmem:[#allocation7 + $0x98] ss:$12 sps:$4 sm:$0xff]   ;;  %v800_v24 = vld [vmem:[#allocation7 + $0xa8] ss:$12 sps:$4 sm:$0xff]   ;;  %v801_v25 = vld [vmem:[#allocation7 + $0xb0] ss:$12 sps:$4 sm:$0xff]  }
  0x40   :  { %v798_v23 = vld [vmem:[#allocation7 + $0xac] ss:$12 sps:$4 sm:$0xff]   ;;  %v805_v26 = vld [vmem:[#allocation9 + $0x4] ss:$12 sps:$4 sm:$0xff]   ;;  %v808_v29 = vld [vmem:[#allocation9 + $0x1c] ss:$12 sps:$4 sm:$0xff]  }
  0x41   :  { %v803_v28 = vld [vmem:[#allocation9] ss:$12 sps:$4 sm:$0xff]   ;;  %v343_v30 = vld [vmem:[%s1084_s5] sm:$0x1]  ;;  %v827_v31 = vld [vmem:[#allocation9 + $0x8] ss:$12 sps:$4 sm:$0xff]  }
  0x42   :  { %256 = vmatpush1.bf16.msra.mxu0 %v780_v9  ;;  %722 = vmatpush3.bf16.msra.mxu1 %v781_v10  ;;  %344 = vst [vmem:[#allocation3] sm:$0x1] %v343_v30  ;;  %v806_v32 = vld [vmem:[#allocation9 + $0x18] ss:$12 sps:$4 sm:$0xff]   ;;  %v811_v33 = vld [vmem:[#allocation9 + $0x34] ss:$12 sps:$4 sm:$0xff]  }
  0x43   :  { %257 = vmatprep.subr.bf16.mxu0 %v782_v11  ;;  %723 = vmatprep.subr.bf16.mxu1 %v946_v0  ;;  %v828_v34 = vld [vmem:[#allocation9 + $0x20] ss:$12 sps:$4 sm:$0xff]   ;;  %v809_v35 = vld [vmem:[#allocation9 + $0x30] ss:$12 sps:$4 sm:$0xff]   ;;  %v829_v37 = vld [vmem:[#allocation9 + $0x38] ss:$12 sps:$4 sm:$0xff]  }
  0x44   :  { %v814_v36 = vld [vmem:[#allocation9 + $0x4c] ss:$12 sps:$4 sm:$0xff]   ;;  %v812_v38 = vld [vmem:[#allocation9 + $0x48] ss:$12 sps:$4 sm:$0xff]   ;;  %v817_v39 = vld [vmem:[#allocation9 + $0x64] ss:$12 sps:$4 sm:$0xff]  }
  0x45   :  { %v830_v40 = vld [vmem:[#allocation9 + $0x50] ss:$12 sps:$4 sm:$0xff]   ;;  %v815_v41 = vld [vmem:[#allocation9 + $0x60] ss:$12 sps:$4 sm:$0xff]   ;;  %v831_v43 = vld [vmem:[#allocation9 + $0x68] ss:$12 sps:$4 sm:$0xff]  }
  0x46   :  { %258 = vmatpush1.bf16.msra.mxu0 %v784_v12  ;;  %724 = vmatpush3.bf16.msra.mxu1 %v785_v13  ;;  %v820_v42 = vld [vmem:[#allocation9 + $0x7c] ss:$12 sps:$4 sm:$0xff]   ;;  %v818_v44 = vld [vmem:[#allocation9 + $0x78] ss:$12 sps:$4 sm:$0xff]   ;;  %v823_v45 = vld [vmem:[#allocation9 + $0x94] ss:$12 sps:$4 sm:$0xff]  }
  0x47   :  { %259 = vmatprep.subr.bf16.mxu0 %v786_v14  ;;  %725 = vmatprep.subr.bf16.mxu1 %v946_v0  ;;  %v832_v46 = vld [vmem:[#allocation9 + $0x80] ss:$12 sps:$4 sm:$0xff]   ;;  %v821_v47 = vld [vmem:[#allocation9 + $0x90] ss:$12 sps:$4 sm:$0xff]   ;;  %v833_v49 = vld [vmem:[#allocation9 + $0x98] ss:$12 sps:$4 sm:$0xff]  }
  0x48   :  { %v826_v48 = vld [vmem:[#allocation9 + $0xac] ss:$12 sps:$4 sm:$0xff]   ;;  %v824_v50 = vld [vmem:[#allocation9 + $0xa8] ss:$12 sps:$4 sm:$0xff]   ;;  %v834_v52 = vld [vmem:[#allocation9 + $0xb0] ss:$12 sps:$4 sm:$0xff]  }
  0x49   :  { %v1055_v51 = vld [vmem:[#allocation3] sm:$0x1]  ;;  %v103_v55 = vshrl.u32 %v102_v54, 7  ;;  %v100_v57 = vld [vmem:[%s1082_s3] sm:$0x7] }
  0x4a   :  { %260 = vmatpush1.bf16.msra.mxu0 %v788_v15  ;;  %726 = vmatpush3.bf16.msra.mxu1 %v789_v16  ;;  %v346_v53 = vpack.c.bf16 %v1055_v51, %v1055_v51  ;;  %v379_v10 = vld [vmem:[%s1083_s4] sm:$0x7]  ;;  %s949_s4 = smov [#allocation10]  }
  0x4b   :  { %261 = vmatprep.subr.bf16.mxu0 %v790_v17  ;;  %727 = vmatprep.subr.bf16.mxu1 %v946_v0  ;;  %v104_v56 = vsub.s32 0, %v103_v55  ;;  %v108_v58 = vsub.s32 1, %v103_v55  ;;  %v112_v59 = vsub.s32 2, %v103_v55  ;;  %s637_s14 = sshll.u32 %s949_s4, 4  ;;  %s638_s14 = int_to_ptr.vmem [resolvable:$true] %s637_s14 }
  0x4c   :  { %s911_s15 = scalar_lea.vmem %s638_s14, 256  ;;  %p916_p11 = scmp.lt.s32.totalorder %s638_s14, %s638_s14 }
  0x4d   :  { %v105_v60 = vrot.slane %v100_v57, %v104_v56  ;;  %v109_v61 = vrot.slane %v100_v57, %v108_v58  ;;  %v113_v62 = vrot.slane %v100_v57, %v112_v59  ;;  %v512_v11 = vrot.slane %v379_v10, %v104_v56  ;;  %p912_p10 = scmp.ne.s32.totalorder %s638_s14, %s911_s15  ;;  %p917_p12 = scmp.lt.s32.totalorder %s911_s15, %s911_s15 }
  0x4e   :  { %262 = vmatpush1.bf16.msra.mxu0 %v792_v18  ;;  %728 = vmatpush3.bf16.msra.mxu1 %v793_v19  ;;  %v516_v12 = vrot.slane %v379_v10, %v108_v58 }
  0x4f   :  { %263 = vmatprep.subr.bf16.mxu0 %v794_v20  ;;  %729 = vmatprep.subr.bf16.mxu1 %v946_v0  ;;  %p918_p13 = por %p917_p12, %p916_p11 }
  0x51   :  { %p919_p0 = pnand %p918_p13, %p912_p10 }
  0x52   :  { %264 = vmatpush1.bf16.msra.mxu0 %v796_v21  ;;  %730 = vmatpush3.bf16.msra.mxu1 %v797_v22 }
  0x53   :  { %265 = vmatprep.subr.bf16.mxu0 %v798_v23  ;;  %731 = vmatprep.subr.bf16.mxu1 %v946_v0 }
  0x56   :  { %266 = vmatpush1.bf16.msra.mxu0 %v800_v24  ;;  %732 = vmatpush3.bf16.msra.mxu1 %v801_v25 }
  0x57   :  { %524 = vmatprep.subr.bf16.mxu0 %v805_v26  ;;  %737 = vmatprep.subr.bf16.mxu1 %v946_v0 }
  0x59   :  { %284 = vmatmul.mubr.bf16.vlgmr.msra.gmra.mrb[0].mxu0 %v802_v27  ;;  %734 = vmatmul.mubr.bf16.vlgmr.msra.gmra.mrb[0].mxu1 %v802_v27 }
  0x5a   :  { %525 = vmatpush1.bf16.msra.mxu0 %v803_v28  ;;  %738 = vmatpush3.bf16.msra.mxu1 %v827_v31 }
  0x5b   :  { %526 = vmatprep.subr.bf16.mxu0 %v808_v29  ;;  %556 = vmatprep.mubr.bf16.mxu0 %v947_v1 }
  0x5c   :  { %739 = vmatprep.subr.bf16.mxu1 %v946_v0  ;;  %753 = vmatprep.mubr.msk.bf16.mxu1 %vm948_vm0, %v946_v0 }
  0x5e   :  { %527 = vmatpush1.bf16.msra.mxu0 %v806_v32  ;;  %740 = vmatpush3.bf16.msra.mxu1 %v828_v34 }
  0x5f   :  { %528 = vmatprep.subr.bf16.mxu0 %v811_v33  ;;  %741 = vmatprep.subr.bf16.mxu1 %v946_v0  ;;  %v520_v33 = vrot.slane %v379_v10, %v112_v59 }
  0x62   :  { %529 = vmatpush1.bf16.msra.mxu0 %v809_v35  ;;  %742 = vmatpush3.bf16.msra.mxu1 %v829_v37 }
  0x63   :  { %530 = vmatprep.subr.bf16.mxu0 %v814_v36  ;;  %743 = vmatprep.subr.bf16.mxu1 %v946_v0 }
  0x66   :  { %531 = vmatpush1.bf16.msra.mxu0 %v812_v38  ;;  %744 = vmatpush3.bf16.msra.mxu1 %v830_v40 }
  0x67   :  { %532 = vmatprep.subr.bf16.mxu0 %v817_v39  ;;  %745 = vmatprep.subr.bf16.mxu1 %v946_v0 }
  0x6a   :  { %533 = vmatpush1.bf16.msra.mxu0 %v815_v41  ;;  %746 = vmatpush3.bf16.msra.mxu1 %v831_v43 }
  0x6b   :  { %534 = vmatprep.subr.bf16.mxu0 %v820_v42  ;;  %747 = vmatprep.subr.bf16.mxu1 %v946_v0 }
  0x6e   :  { %535 = vmatpush1.bf16.msra.mxu0 %v818_v44  ;;  %748 = vmatpush3.bf16.msra.mxu1 %v832_v46 }
  0x6f   :  { %536 = vmatprep.subr.bf16.mxu0 %v823_v45  ;;  %749 = vmatprep.subr.bf16.mxu1 %v946_v0 }
  0x72   :  { %537 = vmatpush1.bf16.msra.mxu0 %v821_v47  ;;  %750 = vmatpush3.bf16.msra.mxu1 %v833_v49 }
  0x73   :  { %538 = vmatprep.subr.bf16.mxu0 %v826_v48  ;;  %751 = vmatprep.subr.bf16.mxu1 %v946_v0 }
  0x76   :  { %539 = vmatpush1.bf16.msra.mxu0 %v824_v50  ;;  %752 = vmatpush3.bf16.msra.mxu1 %v834_v52 }
  0x79   :  { %557 = vmatmul.mubr.bf16.vlgmr.msra.gmra.mrb[4].mxu0 %v346_v53  ;;  %754 = vmatmul.mubr.bf16.vlgmr.msra.gmra.mrb[4].mxu1 %v346_v53 }
 0x12c   :  { %v285_v63 = vpop.f32.mrb[0].mxu0  ;;  %v328_v2 = vpop.f32.mrb[0].mxu1 }
 0x12d   :  { %v286_v0 = vadd.f32 %v285_v63, %v105_v60  ;;  %v287_v1 = vpop.f32.mrb[1].mxu0  ;;  %v329_v4 = vadd.f32 %v328_v2, %v113_v62  ;;  %v735_v6 = vpop.f32.mrb[1].mxu1 }
 0x12e   :  { %v288_v3 = vadd.f32 %v287_v1, %v109_v61  ;;  %v289_v5 = vpop.f32.mrb[2].mxu0  ;;  %v331_v8 = vpop.f32.mrb[2].mxu1 }
 0x12f   :  { %335 = vst [vmem:[#allocation2] sm:$0xff] %v286_v0  ;;  %v291_v7 = vpop.f32.mrb[3].mxu0  ;;  %337 = vst [vmem:[#allocation2 + $0x10] sm:$0xff] %v329_v4  ;;  %v736_v9 = vpop.f32.mrb[3].mxu1 }
 0x130   :  { %336 = vst [vmem:[#allocation2 + $0x8] sm:$0xff] %v288_v3 }
 0x137   :  { %v605_v13 = vld [vmem:[#allocation2] ss:$8 sm:$0x7] }
 0x138   :  { %v613_v19 = vrot.slane %v605_v13, 1  ;;  %v622_v39 = vrot.slane %v605_v13, 2 }
 0x14c   :  { %v558_v14 = vpop.f32.mrb[4].mxu0  ;;  %v599_v17 = vpop.f32.mrb[4].mxu1 }
 0x14d   :  { %v559_v15 = vadd.f32 %v558_v14, %v512_v11  ;;  %v560_v16 = vpop.f32.mrb[5].mxu0  ;;  %v755_v21 = vpop.f32.mrb[5].mxu1  ;;  %v600_v36 = vadd.f32 %v599_v17, %v520_v33 }
 0x14e   :  { %v561_v18 = vadd.f32 %v560_v16, %v516_v12  ;;  %v562_v20 = vpop.f32.mrb[6].mxu0  ;;  %v602_v24 = vpop.f32.mrb[6].mxu1 }
 0x14f   :  { %v606_v22 = vadd.f32 %v605_v13, %v559_v15  ;;  %v563_v23 = vpop.f32.mrb[7].mxu0  ;;  %v756_v26 = vpop.f32.mrb[7].mxu1 }
 0x150   :  { %v615_v25 = vadd.f32 %v613_v19, %v561_v18 }
 0x151   :  { %v607_v27 = vsub.f32 0.0, %v606_v22 }
 0x152   :  { %v616_v29 = vsub.f32 0.0, %v615_v25 }
 0x153   :  { %v608_v28 = vmul.f32 1.442695, %v607_v27 }
 0x154   :  { %v617_v30 = vmul.f32 1.442695, %v616_v29 }
 0x155   :  { %835 = vpow2.f32 %v608_v28 }
 0x156   :  { %837 = vpow2.f32 %v617_v30 }
 0x15f   :  { %v836_v31 = vpop.eup %835 }
 0x160   :  { %v610_v32 = vadd.f32 1.0, %v836_v31  ;;  %v838_v34 = vpop.eup %837 }
 0x161   :  { %v619_v35 = vadd.f32 1.0, %v838_v34 }
 0x162   :  { %839 = vrcp.f32 %v610_v32 }
 0x163   :  { %841 = vrcp.f32 %v619_v35 }
 0x16c   :  { %v840_v37 = vpop.eup %839 }
 0x16d   :  { %v621_v38 = vmul.f32 %v840_v37, %v600_v36  ;;  %v842_v41 = vpop.eup %841 }
 0x16e   :  { %v626_v42 = vsub.f32 1.0, %v842_v41  ;;  %v628_v45 = vmul.f32 %v842_v41, %v1055_v51 }
 0x16f   :  { %v624_v40 = vadd.f32 %v622_v39, %v621_v38 }
 0x171   :  { %843 = vtanh.f32 %v624_v40 }
 0x17b   :  { %v844_v43 = vpop.eup %843 }
 0x17c   :  { %v627_v44 = vmul.f32 %v844_v43, %v626_v42 }
 0x17e   :  { %v629_v46 = vadd.f32 %v628_v45, %v627_v44 }
 0x180   :  { %630 = vst [vmem:[#allocation3] sm:$0x1] %v629_v46  ;;  %631 = vst [vmem:[#allocation10] sm:$0x1] %v629_v46 }
 0x181   :  { %922 = shalt.err (!%p919_p0)
}
 0x182   :  { %s923_s18 = scalar_lea.hbm %s1085_s6, 256 }
 0x183   :  { %p924_p1 = scmp.ne.s32.totalorder %s1085_s6, %s923_s18  ;;  %p927_p2 = scmp.lt.u32.totalorder %s923_s18, %s1085_s6 }
 0x185   :  { %p929_p3 = pnand %p927_p2, %p924_p1 }
 0x187   :  { %932 = shalt.err (!%p929_p3)
}
 0x188   :  { %s950_s22 = smov 128   ;;  %s951_s23 = smov 8  }
 0x189   :  { %643 = dma.vmem_to_hbm [thread:$0]  %s638_s14, 256, %s1085_s6, [#allocation6], %s950_s22, %s950_s22, %s951_s23  }
 0x18a   :  { %937 = dma.done.wait [#allocation6], 256  }
 0x18b   :  { %938 = vsyncadd [#allocation6], 4294967040 }
 0x18c   :  { %647 = vsyncpa [#allocation5], 1 }
 0x18d   :  { %648 = vsyncpa [#allocation8], 1 }
 0x18e   :  { %649 = vsyncpa [#allocation6], 1 }

</bundles_post_ra>
